<compile_context>
chip_gen: v7x
topology: tpu7x:2x2x1
jax: 0.10.0
libtpu: 0.0.40
codegen_flags: <defaults>
</compile_context>

<pallas_src>
import jax
import jax.numpy as jnp
from jax.experimental import pallas as pl
from jax.experimental.pallas import tpu as pltpu


def window_departition(x, hp, wp, p):
    """Pallas implementation of WindowDepartition.forward(x, hp, wp, p)."""
    B, hpwp, pp, C = x.shape
    assert hpwp == hp * wp, "hpwp must equal hp * wp"
    assert pp == p * p, "pp must equal p * p"
    H, W = hp * p, wp * p
    HW = H * W
    itemsize = jnp.dtype(x.dtype).itemsize

    def kernel(x_ref, o_ref):
        # x_ref: (hp*wp, p*p, C) -- all windows of one batch element.
        xb = x_ref[...]
        xb = xb.reshape(hp, wp, p, p, C)
        # Leading-dim-only reorder (no lane crossing): (hp, wp, pr, pc, C)
        # -> (hp, pr, wp, pc, C); last two dims (pc, C) untouched.
        xb = jnp.transpose(xb, (0, 2, 1, 3, 4))
        xb = xb.reshape(HW, C)                      # (H*W, C)
        # Single 2-D lane transpose (XLU) to the channels-first layout.
        o_ref[...] = jnp.transpose(xb, (1, 0))      # (C, H*W) lane-dense store

    # VMEM budget: (in block + out block) x 2 for double buffering, + slack.
    block_bytes = 2 * hpwp * pp * C * itemsize          # in + out per step
    vmem_limit = min(max(4 * block_bytes + (4 << 20), 32 << 20), 100 << 20)
    # TODO(synk): if a single image ever exceeds ~1/4 of VMEM (not the case for
    # MaxViT shapes), split hp into a second grid axis instead of shrinking C.

    total_bytes = 2 * B * HW * C * itemsize             # read + write

    out_flat = pl.pallas_call(
        kernel,
        out_shape=jax.ShapeDtypeStruct((B, C, HW), x.dtype),
        grid=(B,),
        in_specs=[
            # One batch element, all windows, full (p*p, C) extents.
            pl.BlockSpec((None, hpwp, pp, C), lambda b: (b, 0, 0, 0)),
        ],
        # One batch element, all channels, fully flattened (lane-dense) H*W.
        out_specs=pl.BlockSpec((None, C, HW), lambda b: (b, 0, 0)),
        compiler_params=pltpu.CompilerParams(
            dimension_semantics=("parallel",),
            vmem_limit_bytes=vmem_limit,
        ),
        cost_estimate=pl.CostEstimate(
            flops=0, transcendentals=0, bytes_accessed=total_bytes),
    )(x)

    # Free metadata reshape to the module's NCHW output.
    return out_flat.reshape(B, C, H, W)


if __name__ == "__main__":
    # Small, deterministic example consistent with the module's forward:
    #   B=2, hp=2, wp=2, p=8, C=32 -> x: (2, 4, 64, 32), out: (2, 32, 16, 16)
    B, hp, wp, p, C = 2, 2, 2, 8, 32
    key = jax.random.PRNGKey(0)
    x = jax.random.normal(key, (B, hp * wp, p * p, C), dtype=jnp.float32)

    out = window_departition(x, hp, wp, p)
    out = jax.block_until_ready(out)

    # Pure-JAX reference (mirrors the PyTorch module exactly).
    ref = (x.reshape(B, hp, wp, p, p, C)
             .transpose(0, 5, 1, 3, 2, 4)
             .reshape(B, C, hp * p, wp * p))

    assert out.shape == (B, C, hp * p, wp * p)
    assert out.dtype == x.dtype
    assert jnp.array_equal(out, ref), "Pallas output mismatch vs reference"

    print("KERNEL_OK")
</pallas_src>

<mosaic_0001>
module attributes {stable_mosaic.version = 11 : i64} {
  func.func @kernel(%arg0: i32, %arg1: memref<1x4x64x32xf32, #tpu.memory_space<vmem>>, %arg2: memref<1x32x256xf32, #tpu.memory_space<vmem>>) attributes {dimension_semantics = [#tpu.dimension_semantics<parallel>], iteration_bounds = array<i64: 2>, scalar_prefetch = 0 : i64, scratch_operands = 0 : i64, tpu.core_type = #tpu.core_type<tc>, window_params = [{transform_indices = @transform_0, window_bounds = array<i64: 1, 4, 64, 32>}, {transform_indices = @transform_1, window_bounds = array<i64: 1, 32, 256>}]} {
    %c0 = arith.constant 0 : index
    %c0_0 = arith.constant 0 : index
    %c0_1 = arith.constant 0 : index
    %c0_2 = arith.constant 0 : index
    %0 = vector.load %arg1[%c0, %c0_0, %c0_1, %c0_2] : memref<1x4x64x32xf32, #tpu.memory_space<vmem>>, vector<1x4x64x32xf32>
    %1 = vector.shape_cast %0 : vector<1x4x64x32xf32> to vector<4x64x32xf32>
    %2 = vector.shape_cast %1 : vector<4x64x32xf32> to vector<2x2x8x8x32xf32>
    %3 = tpu.transpose %2, [0, 2, 1, 3, 4] : vector<2x2x8x8x32xf32> -> vector<2x8x2x8x32xf32>
    %4 = vector.shape_cast %3 : vector<2x8x2x8x32xf32> to vector<256x32xf32>
    %5 = tpu.transpose %4, [1, 0] : vector<256x32xf32> -> vector<32x256xf32>
    %c0_3 = arith.constant 0 : index
    %c0_4 = arith.constant 0 : index
    %c0_5 = arith.constant 0 : index
    %6 = vector.load %arg2[%c0_3, %c0_4, %c0_5] : memref<1x32x256xf32, #tpu.memory_space<vmem>>, vector<1x32x256xf32>
    %7 = vector.shape_cast %6 : vector<1x32x256xf32> to vector<32x256xf32>
    %8 = vector.shape_cast %5 : vector<32x256xf32> to vector<1x32x256xf32>
    tpu.vector_store %arg2[%c0_3, %c0_4, %c0_5], %8 {strides = array<i32>} : memref<1x32x256xf32, #tpu.memory_space<vmem>>, vector<1x32x256xf32>,
    return
  }
  func.func @transform_0(%arg0: i32) -> (i32, i32, i32, i32) {
    %c0_i32 = arith.constant 0 : i32
    %c0_i32_0 = arith.constant 0 : i32
    %c0_i32_1 = arith.constant 0 : i32
    %c0_i32_2 = arith.constant 0 : i32
    return %arg0, %c0_i32, %c0_i32_0, %c0_i32_1 : i32, i32, i32, i32
  }
  func.func @transform_1(%arg0: i32) -> (i32, i32, i32) {
    %c0_i32 = arith.constant 0 : i32
    %c0_i32_0 = arith.constant 0 : i32
    %c0_i32_1 = arith.constant 0 : i32
    return %arg0, %c0_i32, %c0_i32_0 : i32, i32, i32
  }
}

</mosaic_0001>

<bundles_post_ra>
// kernel: tpu_custom_call.1
= control target key start
LH: loop header
LB: loop body
LE: loop exit
PB: predicated region body
PF: predicated region fallthrough
CT: control target
= control target key end

     0   :  { %6 = vsyncpa [#allocation3], 0  ;;  %s564_s0 = inlined_call_operand.vmem [shape: f32[2,4,64,32], index: 0, kind: input, shape index: {}]   ;;  %s565_s1 = inlined_call_operand.hbm [shape: f32[2,32,256], index: 1, kind: output, shape index: {}]  }
   0x1   :  { %8 = vsyncpa [#allocation3 + $0x1], 0  ;;  %s427_s6 = smov 0   ;;  %s429_s7 = smov 0  }
   0x2   :  { %s431_s8 = smov 0   ;;  %s433_s9 = smov 0  }
   0x3 LB: > { %s448_s10 = sadd.s32 4294967295, %s412_s9   ;;  %s295_s11 = sadd.s32 4294967294, %s412_s9   ;;  %s412_s9 = sphi %s433_s9, %s571_s9   ;;  %s408_s8 = sphi %s431_s8, %s570_s8   ;;  %s404_s7 = sphi %s429_s7, %s569_s7   ;;  %s400_s6 = sphi %s427_s6, %s568_s6  }
   0x4   : > { %s452_s12 = sadd.s32 1, %s412_s9   ;;  %s47_s13 = sadd.s32 1, %s408_s8 }
   0x5   : > { %s44_s14 = ssub.s32 %s412_s9, %s452_s12  ;;  %p57_p0 = scmp.ne.s32.totalorder %s408_s8, %s404_s7 }
   0x6   : > { %p45_p1 = scmp.eq.s32.totalorder %s44_s14, 0  ;;  %p58_p2 = scmp.eq.s32.totalorder %s448_s10, 1 }
   0x7   : > { %p63_p3 = scmp.ne.s32.totalorder %s404_s7, %s400_s6  ;;  %p64_p4 = scmp.eq.s32.totalorder %s295_s11, 1 }
   0x8   : > { %s463_s15 = scalar_select %p45_p1, %s408_s8, %s47_s13  }
   0x9   : > { %p465_p5 = por %p58_p2, %p57_p0  ;;  %p469_p6 = por %p64_p4, %p63_p3 }
   0xa   : > { %p298_p7 = scmp.ge.s32.totalorder %s412_s9, 1  ;;  %p90_p8 = scmp.lt.s32.totalorder %s412_s9, 3 }
   0xc   : > { %p91_p9 = pnand %p298_p7, %p90_p8 }
   0xd   : > { %p110_p10 = scmp.lt.s32.totalorder (!%p91_p9), %s448_s10, 1  ;;  %s107_s23 = sand.u32 (!%p91_p9), 1, %s404_s7  }
   0xe   : > { %94 = sbr.rel (%p91_p9) target bundleno = 183 (0xb7), region = 24  ;;  %s299_s24 = sshll.u32 (!%p91_p9), %s107_s23, 6 }
   0xf   : > { %s109_s25 = scalar_lea.vmem (!%p91_p9), [#allocation2], %s299_s24  ;;  %s308_s27 = sshll.u32 (!%p91_p9), %s448_s10, 10 }
  0x10   : > { %s233_s26 = sshll.u32 (!%p91_p9), %s109_s25, 4  ;;  %s521_s30 = scalar_lea.hbm (!%p91_p9), %s565_s1, %s308_s27  ;;  %s516_s26 = int_to_ptr.vmem [resolvable:$true] %s233_s26 }
  0x11   : > { %s523_s2 = scalar_lea.sflag (!%p91_p9), [#allocation3], %s107_s23  ;;  %s350_s3 = scalar_lea.vmem (!%p91_p9), %s516_s26, 1024 }
  0x12   : > { %p351_p11 = scmp.ne.s32.totalorder (!%p91_p9), %s516_s26, %s350_s3  ;;  %s414_s4 = smov (!%p91_p9), [#allocation2]  }
  0x13   : > { %s354_s5 = sshll.u32 (!%p91_p9), %s414_s4, 4  ;;  %s355_s5 = int_to_ptr.vmem [resolvable:$false] %s354_s5 }
  0x14   : > { %p352_p12 = pnand (!%p91_p9), %p351_p11, %p465_p5  ;;  %p357_p0 = scmp.lt.s32.totalorder (!%p91_p9), %s516_s26, %s355_s5 }
  0x15   : > { %s111_s18 = scalar_select %p110_p10, %s448_s10, 1 }
  0x16   : > { %p353_p13 = pneg %p352_p12  ;;  %s356_s10 = scalar_lea.vmem %s355_s5, 2048 }
  0x17   : > { %s307_s19 = sshll.u32 %s111_s18, 8  ;;  %p358_p1 = scmp.lt.s32.totalorder %s356_s10, %s350_s3 }
  0x18   : > { %s480_s22 = scalar_lea.vmem %s564_s0, %s307_s19 }
  0x19   : > { %v131_v0 = vld [vmem:[%s480_s22 + $0x80] sm:$0xff]  ;;  %v132_v4 = vld [vmem:[%s480_s22 + $0x88] sm:$0xff]  ;;  %v133_v8 = vld [vmem:[%s480_s22 + $0x90] sm:$0xff]  ;;  %p359_p2 = por %p358_p1, %p357_p0 }
  0x1a   : > { %v115_v1 = vld [vmem:[%s480_s22] sm:$0xff]  ;;  %179 = vxpose.xlu1.b32.start [1/16] (narrow) %v131_v0, 32  ;;  %v116_v5 = vld [vmem:[%s480_s22 + $0x8] sm:$0xff]  ;;  %v117_v9 = vld [vmem:[%s480_s22 + $0x10] sm:$0xff] }
  0x1b   : > { %147 = vxpose.xlu0.b32.start [1/16] (narrow) %v115_v1, 32  ;;  %v139_v2 = vld [vmem:[%s480_s22 + $0xc0] sm:$0xff]  ;;  %v140_v6 = vld [vmem:[%s480_s22 + $0xc8] sm:$0xff]  ;;  %v141_v10 = vld [vmem:[%s480_s22 + $0xd0] sm:$0xff]  ;;  %p360_p3 = pnand %p359_p2, %p353_p13 }
  0x1c   : > { %v123_v3 = vld [vmem:[%s480_s22 + $0x40] sm:$0xff]  ;;  %v124_v7 = vld [vmem:[%s480_s22 + $0x48] sm:$0xff]  ;;  %v125_v11 = vld [vmem:[%s480_s22 + $0x50] sm:$0xff] }
  0x1d   : > { %v134_v12 = vld [vmem:[%s480_s22 + $0x98] sm:$0xff]  ;;  %v135_v16 = vld [vmem:[%s480_s22 + $0xa0] sm:$0xff]  ;;  %v136_v20 = vld [vmem:[%s480_s22 + $0xa8] sm:$0xff] }
  0x1e   : > { %180 = vxpose.xlu1.b32.cont [2/16] (narrow) %v139_v2, 32  ;;  %v118_v13 = vld [vmem:[%s480_s22 + $0x18] sm:$0xff]  ;;  %v119_v17 = vld [vmem:[%s480_s22 + $0x20] sm:$0xff]  ;;  %v120_v21 = vld [vmem:[%s480_s22 + $0x28] sm:$0xff] }
  0x1f   : > { %148 = vxpose.xlu0.b32.cont [2/16] (narrow) %v123_v3, 32  ;;  %v142_v14 = vld [vmem:[%s480_s22 + $0xd8] sm:$0xff]  ;;  %v143_v18 = vld [vmem:[%s480_s22 + $0xe0] sm:$0xff]  ;;  %v144_v22 = vld [vmem:[%s480_s22 + $0xe8] sm:$0xff] }
  0x20   : > { %v126_v15 = vld [vmem:[%s480_s22 + $0x58] sm:$0xff]  ;;  %v127_v19 = vld [vmem:[%s480_s22 + $0x60] sm:$0xff]  ;;  %v128_v23 = vld [vmem:[%s480_s22 + $0x68] sm:$0xff] }
  0x21   : > { %v137_v24 = vld [vmem:[%s480_s22 + $0xb0] sm:$0xff]  ;;  %v138_v28 = vld [vmem:[%s480_s22 + $0xb8] sm:$0xff] }
  0x22   : > { %181 = vxpose.xlu1.b32.cont [3/16] (narrow) %v132_v4, 32  ;;  %v121_v25 = vld [vmem:[%s480_s22 + $0x30] sm:$0xff]  ;;  %v122_v29 = vld [vmem:[%s480_s22 + $0x38] sm:$0xff] }
  0x23   : > { %149 = vxpose.xlu0.b32.cont [3/16] (narrow) %v116_v5, 32  ;;  %v145_v26 = vld [vmem:[%s480_s22 + $0xf0] sm:$0xff]  ;;  %v146_v30 = vld [vmem:[%s480_s22 + $0xf8] sm:$0xff] }
  0x24   : > { %v129_v27 = vld [vmem:[%s480_s22 + $0x70] sm:$0xff]  ;;  %v130_v31 = vld [vmem:[%s480_s22 + $0x78] sm:$0xff] }
  0x26   : > { %182 = vxpose.xlu1.b32.cont [4/16] (narrow) %v140_v6, 32 }
  0x27   : > { %150 = vxpose.xlu0.b32.cont [4/16] (narrow) %v124_v7, 32 }
  0x2a   : > { %183 = vxpose.xlu1.b32.cont [5/16] (narrow) %v133_v8, 32 }
  0x2b   : > { %151 = vxpose.xlu0.b32.cont [5/16] (narrow) %v117_v9, 32 }
  0x2e   : > { %184 = vxpose.xlu1.b32.cont [6/16] (narrow) %v141_v10, 32 }
  0x2f   : > { %152 = vxpose.xlu0.b32.cont [6/16] (narrow) %v125_v11, 32 }
  0x32   : > { %185 = vxpose.xlu1.b32.cont [7/16] (narrow) %v134_v12, 32 }
  0x33   : > { %153 = vxpose.xlu0.b32.cont [7/16] (narrow) %v118_v13, 32 }
  0x36   : > { %186 = vxpose.xlu1.b32.cont [8/16] (narrow) %v142_v14, 32 }
  0x37   : > { %154 = vxpose.xlu0.b32.cont [8/16] (narrow) %v126_v15, 32 }
  0x3a   : > { %187 = vxpose.xlu1.b32.cont [9/16] (narrow) %v135_v16, 32 }
  0x3b   : > { %155 = vxpose.xlu0.b32.cont [9/16] (narrow) %v119_v17, 32 }
  0x3e   : > { %188 = vxpose.xlu1.b32.cont [10/16] (narrow) %v143_v18, 32 }
  0x3f   : > { %156 = vxpose.xlu0.b32.cont [10/16] (narrow) %v127_v19, 32 }
  0x42   : > { %189 = vxpose.xlu1.b32.cont [11/16] (narrow) %v136_v20, 32 }
  0x43   : > { %157 = vxpose.xlu0.b32.cont [11/16] (narrow) %v120_v21, 32 }
  0x46   : > { %190 = vxpose.xlu1.b32.cont [12/16] (narrow) %v144_v22, 32 }
  0x47   : > { %158 = vxpose.xlu0.b32.cont [12/16] (narrow) %v128_v23, 32 }
  0x4a   : > { %191 = vxpose.xlu1.b32.cont [13/16] (narrow) %v137_v24, 32 }
  0x4b   : > { %159 = vxpose.xlu0.b32.cont [13/16] (narrow) %v121_v25, 32 }
  0x4e   : > { %192 = vxpose.xlu1.b32.cont [14/16] (narrow) %v145_v26, 32 }
  0x4f   : > { %160 = vxpose.xlu0.b32.cont [14/16] (narrow) %v129_v27, 32 }
  0x52   : > { %193 = vxpose.xlu1.b32.cont [15/16] (narrow) %v138_v28, 32 }
  0x53   : > { %161 = vxpose.xlu0.b32.cont [15/16] (narrow) %v122_v29, 32 }
  0x56   : > { %194 = vxpose.xlu1.b32.end [16/16] (narrow) %v146_v30, 32 }
  0x57   : > { %162 = vxpose.xlu0.b32.end [16/16] (narrow) %v130_v31, 32 }
  0x9a   : > { %v195_v32 = vpop.trf.xlu1 }
  0x9b   : > { %v163_v33 = vpop.trf.xlu0  ;;  %212 = vst [vmem:[%s109_s25 + $0x8] sm:$0xff] %v195_v32 }
  0x9c   : > { %211 = vst [vmem:[%s109_s25] sm:$0xff] %v163_v33 }
  0x9e   : > { %v196_v34 = vpop.trf.xlu1 }
  0x9f   : > { %v164_v35 = vpop.trf.xlu0  ;;  %214 = vst [vmem:[%s109_s25 + $0x18] sm:$0xff] %v196_v34 }
  0xa0   : > { %213 = vst [vmem:[%s109_s25 + $0x10] sm:$0xff] %v164_v35 }
  0xa2   : > { %v197_v36 = vpop.trf.xlu1 }
  0xa3   : > { %v165_v37 = vpop.trf.xlu0  ;;  %216 = vst [vmem:[%s109_s25 + $0x28] sm:$0xff] %v197_v36 }
  0xa4   : > { %215 = vst [vmem:[%s109_s25 + $0x20] sm:$0xff] %v165_v37 }
  0xa6   : > { %v198_v38 = vpop.trf.xlu1 }
  0xa7   : > { %v166_v39 = vpop.trf.xlu0  ;;  %218 = vst [vmem:[%s109_s25 + $0x38] sm:$0xff] %v198_v38 }
  0xa8   : > { %217 = vst [vmem:[%s109_s25 + $0x30] sm:$0xff] %v166_v39 }
  0xa9   : > { %363 = shalt.err (!%p360_p3)
}
  0xaa   : > { %s364_s11 = scalar_lea.hbm %s521_s30, 1024  ;;  %s368_s18 = scalar_lea.hbm %s565_s1, 2048 }
  0xab   : > { %p365_p4 = scmp.ne.s32.totalorder %s521_s30, %s364_s11  ;;  %p369_p9 = scmp.lt.u32.totalorder %s521_s30, %s565_s1 }
  0xac   : > { %p370_p10 = scmp.lt.u32.totalorder %s368_s18, %s364_s11  ;;  %p372_p12 = scmp.lt.u32.totalorder %s364_s11, %s521_s30 }
  0xad   : > { %p366_p7 = pnand %p365_p4, %p465_p5 }
  0xae   : > { %p371_p11 = por %p370_p10, %p369_p9 }
  0xaf   : > { %p367_p8 = pneg %p366_p7 }
  0xb0   : > { %p373_p13 = por %p372_p12, %p371_p11 }
  0xb2   : > { %p374_p0 = pnand %p373_p13, %p367_p8 }
  0xb4   : > { %377 = shalt.err (!%p374_p0)
}
  0xb5   : > { %s415_s21 = smov 256   ;;  %s416_s22 = smov 16  }
  0xb6   : > { %309 = dma.vmem_to_hbm [thread:$0]  (%p465_p5), %s516_s26, 1024, %s521_s30, %s523_s2, %s415_s21, %s415_s21, %s416_s22  }
  0xb7 PF: > { %p315_p1 = scmp.ge.s32.totalorder %s412_s9, 2  ;;  %s248_s23 = sand.u32 1, %s400_s6  }
  0xb8   : > { %s249_s24 = scalar_lea.sflag [#allocation3], %s248_s23 }
  0xb9   : > { %p312_p2 = pnand %p315_p1, %p469_p6 }
  0xbb   : > { %395 = dma.done.wait (!%p312_p2), %s249_s24, 1024  }
  0xbc   : > { %397 = vsyncadd (!%p312_p2), %s249_s24, 4294966272  ;;  %p11_p3 = scmp.ge.s32.totalorder %s452_s12, 4   ;;  %s568_s6 = smov %s404_s7 }
  0xbd   : > { %s569_s7 = smov %s408_s8  ;;  %s570_s8 = smov %s463_s15 }
  0xbe   : > { %s571_s9 = smov %s452_s12  ;;  %13 = sbr.rel (!%p11_p3) target bundleno = 3 (0x3), region = 59 }
  0xc5   :  { %254 = vsyncpa [#allocation3], 1 }
  0xc6   :  { %256 = vsyncpa [#allocation3 + $0x1], 1 }

</bundles_post_ra>
